<compile_context>
chip_gen: v6e
topology: v6e:2x2x1
jax: 0.10.0
libtpu: 0.0.40
codegen_flags: <defaults>
</compile_context>

<pallas_src>
import functools

import jax
import jax.numpy as jnp
from jax.experimental import pallas as pl
from jax.experimental.pallas import tpu as pltpu

_SQRT1_2 = 0.7071067811865476


def _layernorm(x, g, b, eps):
    mu = jnp.mean(x, axis=-1, keepdims=True)
    var = jnp.mean((x - mu) ** 2, axis=-1, keepdims=True)
    return (x - mu) * jax.lax.rsqrt(var + eps) * g + b


def _erf(x):
    # Abramowitz & Stegun 7.1.26, |err| < 1.5e-7 (fp32-level accuracy).
    # TODO(synk): swap for lax.erf if erf_p lowering is guaranteed in Mosaic.
    a1, a2, a3, a4, a5 = 0.254829592, -0.284496736, 1.421413741, -1.453152027, 1.061405429
    p = 0.3275911
    sgn = jnp.where(x >= 0.0, 1.0, -1.0)
    ax = jnp.abs(x)
    t = 1.0 / (1.0 + p * ax)
    poly = ((((a5 * t + a4) * t + a3) * t + a2) * t + a1) * t
    return sgn * (1.0 - poly * jnp.exp(-ax * ax))


def _gelu_exact(x):
    # F.gelu default (erf-based, approximate='none')
    return 0.5 * x * (1.0 + _erf(x * _SQRT1_2))


# ---------------------------------------------------------------------------
# Phase 1: LN0 -> fused channel_proj_i -> GELU -> {gate partial sum, LN(v)}
# ---------------------------------------------------------------------------
def _phase1_kernel(d_ffn,
                   x_ref,                      # (S, Dm)   one batch block of rows
                   ln0_g, ln0_b,               # (1, Dm)   gMLP LayerNorm (eps=1e-12)
                   w1, b1,                     # (Dm, 2F), (1, 2F)  fused channel_proj_i
                   stg_g, stg_b,               # (1, F)    SpatialTokenGen LayerNorm
                   stg_m,                      # (S, F)    conv_w[s]*lin_w[f] fused weights
                   sgu_g, sgu_b,               # (1, F)    SGU LayerNorm
                   vn_ref,                     # (S, F)    LN(v) staged for phase 2
                   gate_ref):                  # (1, 1)    resident gate-sum accumulator
    b = pl.program_id(0)

    xn = _layernorm(x_ref[...], ln0_g[...], ln0_b[...], 1e-12)
    # one MXU pass for both chunk halves (u | v)
    h = _gelu_exact(jnp.dot(xn, w1[...], preferred_element_type=jnp.float32) + b1[...])
    u = h[:, :d_ffn]
    v = h[:, d_ffn:]

    # ---- SpatialTokenGen partial: sum_{s,f} LN(u)[s,f] * conv_w[s] * lin_w[f] ----
    un = _layernorm(u, stg_g[...], stg_b[...], 1e-5)
    partial = jnp.sum(jnp.sum(un * stg_m[...], axis=-1, keepdims=True),
                      axis=0, keepdims=True)                       # (1, 1)

    @pl.when(b == 0)
    def _():
        gate_ref[...] = jnp.zeros_like(gate_ref)

    gate_ref[...] += partial

    # ---- SGU LayerNorm(v), written out for the gated spatial path ----
    vn_ref[...] = _layernorm(v, sgu_g[...], sgu_b[...], 1e-5)


# ---------------------------------------------------------------------------
# Phase 2: gated spatial 1x1 conv (seq matmul) -> channel_proj_ii -> + residual
# ---------------------------------------------------------------------------
def _phase2_kernel(x_ref,                      # (S, Dm)   residual rows
                   vn_ref,                     # (S, F)    LN(v)
                   w_ref, bsel_ref,            # (S, S), (S, 1)   selected spatial_proj
                   w2_ref, b2_ref,             # (F, Dm), (1, Dm) channel_proj_ii
                   o_ref):                     # (S, Dm)
    # TODO(synk): for large S, reformulate as vn^T @ W^T (M=F drives the MXU) or cast the
    # big dots to bf16 with f32 accumulation; unnecessary at these toy shapes.
    vo = jnp.dot(w_ref[...], vn_ref[...], preferred_element_type=jnp.float32) + bsel_ref[...]
    y = jnp.dot(vo, w2_ref[...], preferred_element_type=jnp.float32) + b2_ref[...]
    o_ref[...] = (x_ref[...] + y).astype(o_ref.dtype)


def _full_spec(shape):
    nd = len(shape)
    return pl.BlockSpec(shape, lambda b: (0,) * nd)


def gmlp_block(x, p):
    B, S, Dm = x.shape
    F = p["stg_lw"].shape[1]
    xf = x.reshape(B * S, Dm)

    # Fused, lane-dense SpatialTokenGen weights: M[s, f] = conv_w[s] * lin_w[f]
    stg_m = p["stg_cw"].reshape(S, 1) * p["stg_lw"]                # (S, F)

    row_spec_x = pl.BlockSpec((S, Dm), lambda b: (b, 0))
    row_spec_v = pl.BlockSpec((S, F), lambda b: (b, 0))

    vn, gate_sum = pl.pallas_call(
        functools.partial(_phase1_kernel, F),
        grid=(B,),
        in_specs=[row_spec_x,
                  _full_spec((1, Dm)), _full_spec((1, Dm)),
                  _full_spec((Dm, 2 * F)), _full_spec((1, 2 * F)),
                  _full_spec((1, F)), _full_spec((1, F)),
                  _full_spec((S, F)),
                  _full_spec((1, F)), _full_spec((1, F))],
        out_specs=(row_spec_v, _full_spec((1, 1))),
        out_shape=(jax.ShapeDtypeStruct((B * S, F), jnp.float32),
                   jax.ShapeDtypeStruct((1, 1), jnp.float32)),
        compiler_params=pltpu.CompilerParams(dimension_semantics=("arbitrary",)),
    )(xf, p["ln0_g"], p["ln0_b"], p["w1"], p["b1"],
      p["stg_g"], p["stg_b"], stg_m, p["sgu_g"], p["sgu_b"])

    # ---- resolve the scalar gate in plain JAX (cheap), pick the spatial_proj branch ----
    tok_pre = (gate_sum[0, 0] / B
               + p["stg_lin_b"] * jnp.sum(p["stg_cw"])
               + p["stg_conv_b"])
    gate = tok_pre > 0.0                        # == sigmoid(tok_pre) > 0.5
    w_sel = jnp.where(gate, p["pi_w"], p["pii_w"])                 # (S, S)
    b_sel = jnp.where(gate, p["pi_b"], p["pii_b"])                 # (S, 1)

    out = pl.pallas_call(
        _phase2_kernel,
        grid=(B,),
        in_specs=[row_spec_x, row_spec_v,
                  _full_spec((S, S)), _full_spec((S, 1)),
                  _full_spec((F, Dm)), _full_spec((1, Dm))],
        out_specs=row_spec_x,
        out_shape=jax.ShapeDtypeStruct((B * S, Dm), jnp.float32),
        compiler_params=pltpu.CompilerParams(dimension_semantics=("parallel",)),
    )(xf, vn, w_sel, b_sel, p["w2"], p["b2"])

    return out.reshape(B, S, Dm)


def init_params(key, d_model, d_ffn, seq_len):
    ks = jax.random.split(key, 10)

    def unif(k, shape, fan_in):
        bound = 1.0 / (fan_in ** 0.5)
        return jax.random.uniform(k, shape, jnp.float32, -bound, bound)

    p = {}
    p["ln0_g"] = jnp.ones((1, d_model), jnp.float32)
    p["ln0_b"] = jnp.zeros((1, d_model), jnp.float32)
    p["w1"] = unif(ks[0], (d_model, 2 * d_ffn), d_model)   # Linear(d_model, 2*d_ffn).weight^T
    p["b1"] = unif(ks[1], (1, 2 * d_ffn), d_model)
    p["stg_g"] = jnp.ones((1, d_ffn), jnp.float32)
    p["stg_b"] = jnp.zeros((1, d_ffn), jnp.float32)
    p["stg_lw"] = unif(ks[2], (1, d_ffn), d_ffn)           # Linear(d_ffn, 1)
    p["stg_lin_b"] = float(unif(ks[3], (), d_ffn))
    p["stg_cw"] = unif(ks[4], (seq_len,), seq_len)         # Conv1d(seq_len, 1, 1)
    p["stg_conv_b"] = float(unif(ks[5], (), seq_len))
    p["sgu_g"] = jnp.ones((1, d_ffn), jnp.float32)
    p["sgu_b"] = jnp.zeros((1, d_ffn), jnp.float32)
    p["pi_w"] = unif(ks[6], (seq_len, seq_len), seq_len)   # Conv1d(seq, seq, 1)
    p["pi_b"] = jnp.ones((seq_len, 1), jnp.float32)        # nn.init.constant_(bias, 1.0)
    p["pii_w"] = unif(ks[7], (seq_len, seq_len), seq_len)
    p["pii_b"] = jnp.ones((seq_len, 1), jnp.float32)       # nn.init.constant_(bias, 1.0)
    p["w2"] = unif(ks[8], (d_ffn, d_model), d_ffn)         # Linear(d_ffn, d_model).weight^T
    p["b2"] = unif(ks[9], (1, d_model), d_ffn)
    return p


def gmlp_block_ref(x, p):
    # pure-JAX reference for correctness checking
    hp = jax.lax.Precision.HIGHEST

    def ln(z, g, b, eps):
        mu = z.mean(-1, keepdims=True)
        var = ((z - mu) ** 2).mean(-1, keepdims=True)
        return (z - mu) / jnp.sqrt(var + eps) * g + b

    Fh = p["stg_lw"].shape[1]
    xn = ln(x, p["ln0_g"][0], p["ln0_b"][0], 1e-12)
    h = jnp.einsum("bsd,df->bsf", xn, p["w1"], precision=hp) + p["b1"][0]
    h = 0.5 * h * (1.0 + jax.scipy.special.erf(h * _SQRT1_2))
    u, v = h[..., :Fh], h[..., Fh:]
    un = ln(u, p["stg_g"][0], p["stg_b"][0], 1e-5)
    s1 = jnp.einsum("bsf,f->bs", un, p["stg_lw"][0], precision=hp) + p["stg_lin_b"]
    s2 = jnp.einsum("bs,s->b", s1, p["stg_cw"], precision=hp) + p["stg_conv_b"]
    tok = jax.nn.sigmoid(jnp.mean(s2))
    vn = ln(v, p["sgu_g"][0], p["sgu_b"][0], 1e-5)
    W = jnp.where(tok > 0.5, p["pi_w"], p["pii_w"])
    bb = jnp.where(tok > 0.5, p["pi_b"], p["pii_b"])
    vo = jnp.einsum("ts,bsf->btf", W, vn, precision=hp) + bb[None]
    y = jnp.einsum("bsf,fd->bsd", vo, p["w2"], precision=hp) + p["b2"][0]
    return x + y


if __name__ == "__main__":
    B, SEQ, D_MODEL, D_FFN = 2, 8, 32, 16
    key = jax.random.PRNGKey(0)
    kx, kp = jax.random.split(key)
    x = jax.random.normal(kx, (B, SEQ, D_MODEL), jnp.float32)
    params = init_params(kp, D_MODEL, D_FFN, SEQ)

    out = gmlp_block(x, params)
    out = jax.block_until_ready(out)

    ref = gmlp_block_ref(x, params)
    assert out.shape == (B, SEQ, D_MODEL)
    assert jnp.allclose(out, ref, atol=2e-3, rtol=2e-3), float(jnp.max(jnp.abs(out - ref)))
    print("KERNEL_OK")
</pallas_src>

<mosaic_0001>
module attributes {stable_mosaic.version = 11 : i64} {
  func.func @_phase1_kernel(%arg0: i32, %arg1: memref<8x32xf32, #tpu.memory_space<vmem>>, %arg2: memref<1x32xf32, #tpu.memory_space<vmem>>, %arg3: memref<1x32xf32, #tpu.memory_space<vmem>>, %arg4: memref<32x32xf32, #tpu.memory_space<vmem>>, %arg5: memref<1x32xf32, #tpu.memory_space<vmem>>, %arg6: memref<1x16xf32, #tpu.memory_space<vmem>>, %arg7: memref<1x16xf32, #tpu.memory_space<vmem>>, %arg8: memref<8x16xf32, #tpu.memory_space<vmem>>, %arg9: memref<1x16xf32, #tpu.memory_space<vmem>>, %arg10: memref<1x16xf32, #tpu.memory_space<vmem>>, %arg11: memref<8x16xf32, #tpu.memory_space<vmem>>, %arg12: memref<1x1xf32, #tpu.memory_space<vmem>>) attributes {dimension_semantics = [#tpu.dimension_semantics<arbitrary>], iteration_bounds = array<i64: 2>, scalar_prefetch = 0 : i64, scratch_operands = 0 : i64, tpu.core_type = #tpu.core_type<tc>, window_params = [{transform_indices = @transform_0, window_bounds = array<i64: 8, 32>}, {pipeline_mode = #tpu.pipeline_mode<synchronous>, transform_indices = @transform_1, window_bounds = array<i64: 1, 32>}, {pipeline_mode = #tpu.pipeline_mode<synchronous>, transform_indices = @transform_2, window_bounds = array<i64: 1, 32>}, {pipeline_mode = #tpu.pipeline_mode<synchronous>, transform_indices = @transform_3, window_bounds = array<i64: 32, 32>}, {pipeline_mode = #tpu.pipeline_mode<synchronous>, transform_indices = @transform_4, window_bounds = array<i64: 1, 32>}, {pipeline_mode = #tpu.pipeline_mode<synchronous>, transform_indices = @transform_5, window_bounds = array<i64: 1, 16>}, {pipeline_mode = #tpu.pipeline_mode<synchronous>, transform_indices = @transform_6, window_bounds = array<i64: 1, 16>}, {pipeline_mode = #tpu.pipeline_mode<synchronous>, transform_indices = @transform_7, window_bounds = array<i64: 8, 16>}, {pipeline_mode = #tpu.pipeline_mode<synchronous>, transform_indices = @transform_8, window_bounds = array<i64: 1, 16>}, {pipeline_mode = #tpu.pipeline_mode<synchronous>, transform_indices = @transform_9, window_bounds = array<i64: 1, 16>}, {transform_indices = @transform_10, window_bounds = array<i64: 8, 16>}, {pipeline_mode = #tpu.pipeline_mode<synchronous>, transform_indices = @transform_11, window_bounds = array<i64: 1, 1>}]} {
    %c0 = arith.constant 0 : index
    %c0_0 = arith.constant 0 : index
    %0 = vector.load %arg1[%c0, %c0_0] : memref<8x32xf32, #tpu.memory_space<vmem>>, vector<8x32xf32>
    %c0_1 = arith.constant 0 : index
    %c0_2 = arith.constant 0 : index
    %1 = vector.load %arg2[%c0_1, %c0_2] : memref<1x32xf32, #tpu.memory_space<vmem>>, vector<1x32xf32>
    %c0_3 = arith.constant 0 : index
    %c0_4 = arith.constant 0 : index
    %2 = vector.load %arg3[%c0_3, %c0_4] : memref<1x32xf32, #tpu.memory_space<vmem>>, vector<1x32xf32>
    %cst = arith.constant dense<0.000000e+00> : vector<8xf32>
    %3 = vector.multi_reduction <add>, %0, %cst [1] : vector<8x32xf32> to vector<8xf32>
    %4 = vector.shape_cast %3 : vector<8xf32> to vector<8x1xf32>
    %cst_5 = arith.constant 3.200000e+01 : f32
    %5 = vector.broadcast %cst_5 : f32 to vector<8x1xf32>
    %6 = arith.divf %4, %5 : vector<8x1xf32>
    %7 = vector.broadcast %6 : vector<8x1xf32> to vector<8x32xf32>
    %8 = arith.subf %0, %7 : vector<8x32xf32>
    %9 = arith.mulf %8, %8 : vector<8x32xf32>
    %cst_6 = arith.constant dense<0.000000e+00> : vector<8xf32>
    %10 = vector.multi_reduction <add>, %9, %cst_6 [1] : vector<8x32xf32> to vector<8xf32>
    %11 = vector.shape_cast %10 : vector<8xf32> to vector<8x1xf32>
    %cst_7 = arith.constant 3.200000e+01 : f32
    %12 = vector.broadcast %cst_7 : f32 to vector<8x1xf32>
    %13 = arith.divf %11, %12 : vector<8x1xf32>
    %14 = vector.broadcast %6 : vector<8x1xf32> to vector<8x32xf32>
    %15 = arith.subf %0, %14 : vector<8x32xf32>
    %cst_8 = arith.constant 9.99999996E-13 : f32
    %16 = vector.broadcast %cst_8 : f32 to vector<8x1xf32>
    %17 = arith.addf %13, %16 : vector<8x1xf32>
    %18 = math.rsqrt %17 : vector<8x1xf32>
    %19 = vector.broadcast %18 : vector<8x1xf32> to vector<8x32xf32>
    %20 = arith.mulf %15, %19 : vector<8x32xf32>
    %21 = vector.broadcast %1 : vector<1x32xf32> to vector<8x32xf32>
    %22 = arith.mulf %20, %21 : vector<8x32xf32>
    %23 = vector.broadcast %2 : vector<1x32xf32> to vector<8x32xf32>
    %24 = arith.addf %22, %23 : vector<8x32xf32>
    %c0_9 = arith.constant 0 : index
    %c0_10 = arith.constant 0 : index
    %25 = vector.load %arg4[%c0_9, %c0_10] : memref<32x32xf32, #tpu.memory_space<vmem>>, vector<32x32xf32>
    %cst_11 = arith.constant dense<0.000000e+00> : vector<8x32xf32>
    %26 = tpu.matmul %24, %25, %cst_11 {dimension_numbers = #tpu.dot_dimension_numbers<[1], [0], [0], [1], [0, 0, 1, 1], [], []>} : vector<8x32xf32>, vector<32x32xf32>, vector<8x32xf32> -> vector<8x32xf32>
    %c0_12 = arith.constant 0 : index
    %c0_13 = arith.constant 0 : index
    %27 = vector.load %arg5[%c0_12, %c0_13] : memref<1x32xf32, #tpu.memory_space<vmem>>, vector<1x32xf32>
    %28 = vector.broadcast %27 : vector<1x32xf32> to vector<8x32xf32>
    %29 = arith.addf %26, %28 : vector<8x32xf32>
    %cst_14 = arith.constant 5.000000e-01 : f32
    %30 = vector.broadcast %cst_14 : f32 to vector<8x32xf32>
    %31 = arith.mulf %30, %29 : vector<8x32xf32>
    %cst_15 = arith.constant 0.707106769 : f32
    %32 = vector.broadcast %cst_15 : f32 to vector<8x32xf32>
    %33 = arith.mulf %29, %32 : vector<8x32xf32>
    %cst_16 = arith.constant 0.000000e+00 : f32
    %34 = vector.broadcast %cst_16 : f32 to vector<8x32xf32>
    %35 = arith.cmpf oge, %33, %34 : vector<8x32xf32>
    %cst_17 = arith.constant 1.000000e+00 : f32
    %cst_18 = arith.constant -1.000000e+00 : f32
    %36 = vector.broadcast %cst_17 : f32 to vector<8x32xf32>
    %37 = vector.broadcast %cst_18 : f32 to vector<8x32xf32>
    %38 = arith.select %35, %36, %37 : vector<8x32xi1>, vector<8x32xf32>
    %39 = math.absf %33 : vector<8x32xf32>
    %cst_19 = arith.constant 0.327591091 : f32
    %40 = vector.broadcast %cst_19 : f32 to vector<8x32xf32>
    %41 = arith.mulf %40, %39 : vector<8x32xf32>
    %cst_20 = arith.constant 1.000000e+00 : f32
    %42 = vector.broadcast %cst_20 : f32 to vector<8x32xf32>
    %43 = arith.addf %42, %41 : vector<8x32xf32>
    %cst_21 = arith.constant 1.000000e+00 : f32
    %44 = vector.broadcast %cst_21 : f32 to vector<8x32xf32>
    %45 = arith.divf %44, %43 : vector<8x32xf32>
    %cst_22 = arith.constant 1.06140542 : f32
    %46 = vector.broadcast %cst_22 : f32 to vector<8x32xf32>
    %47 = arith.mulf %46, %45 : vector<8x32xf32>
    %cst_23 = arith.constant -1.45315206 : f32
    %48 = vector.broadcast %cst_23 : f32 to vector<8x32xf32>
    %49 = arith.addf %47, %48 : vector<8x32xf32>
    %50 = arith.mulf %49, %45 : vector<8x32xf32>
    %cst_24 = arith.constant 1.42141378 : f32
    %51 = vector.broadcast %cst_24 : f32 to vector<8x32xf32>
    %52 = arith.addf %50, %51 : vector<8x32xf32>
    %53 = arith.mulf %52, %45 : vector<8x32xf32>
    %cst_25 = arith.constant -0.284496725 : f32
    %54 = vector.broadcast %cst_25 : f32 to vector<8x32xf32>
    %55 = arith.addf %53, %54 : vector<8x32xf32>
    %56 = arith.mulf %55, %45 : vector<8x32xf32>
    %cst_26 = arith.constant 0.254829586 : f32
    %57 = vector.broadcast %cst_26 : f32 to vector<8x32xf32>
    %58 = arith.addf %56, %57 : vector<8x32xf32>
    %59 = arith.mulf %58, %45 : vector<8x32xf32>
    %cst_27 = arith.constant 0.000000e+00 : f32
    %60 = vector.broadcast %cst_27 : f32 to vector<8x32xf32>
    %61 = arith.subf %60, %39 : vector<8x32xf32>
    %62 = arith.mulf %61, %39 : vector<8x32xf32>
    %63 = math.exp %62 : vector<8x32xf32>
    %64 = arith.mulf %59, %63 : vector<8x32xf32>
    %cst_28 = arith.constant 1.000000e+00 : f32
    %65 = vector.broadcast %cst_28 : f32 to vector<8x32xf32>
    %66 = arith.subf %65, %64 : vector<8x32xf32>
    %67 = arith.mulf %38, %66 : vector<8x32xf32>
    %cst_29 = arith.constant 1.000000e+00 : f32
    %68 = vector.broadcast %cst_29 : f32 to vector<8x32xf32>
    %69 = arith.addf %68, %67 : vector<8x32xf32>
    %70 = arith.mulf %31, %69 : vector<8x32xf32>
    %71 = vector.extract_strided_slice %70 {offsets = [0, 0], sizes = [8, 16], strides = [1, 1]} : vector<8x32xf32> to vector<8x16xf32>
    %72 = vector.extract_strided_slice %70 {offsets = [0, 16], sizes = [8, 16], strides = [1, 1]} : vector<8x32xf32> to vector<8x16xf32>
    %c0_30 = arith.constant 0 : index
    %c0_31 = arith.constant 0 : index
    %73 = vector.load %arg6[%c0_30, %c0_31] : memref<1x16xf32, #tpu.memory_space<vmem>>, vector<1x16xf32>
    %c0_32 = arith.constant 0 : index
    %c0_33 = arith.constant 0 : index
    %74 = vector.load %arg7[%c0_32, %c0_33] : memref<1x16xf32, #tpu.memory_space<vmem>>, vector<1x16xf32>
    %cst_34 = arith.constant dense<0.000000e+00> : vector<8xf32>
    %75 = vector.multi_reduction <add>, %71, %cst_34 [1] : vector<8x16xf32> to vector<8xf32>
    %76 = vector.shape_cast %75 : vector<8xf32> to vector<8x1xf32>
    %cst_35 = arith.constant 1.600000e+01 : f32
    %77 = vector.broadcast %cst_35 : f32 to vector<8x1xf32>
    %78 = arith.divf %76, %77 : vector<8x1xf32>
    %79 = vector.broadcast %78 : vector<8x1xf32> to vector<8x16xf32>
    %80 = arith.subf %71, %79 : vector<8x16xf32>
    %81 = arith.mulf %80, %80 : vector<8x16xf32>
    %cst_36 = arith.constant dense<0.000000e+00> : vector<8xf32>
    %82 = vector.multi_reduction <add>, %81, %cst_36 [1] : vector<8x16xf32> to vector<8xf32>
    %83 = vector.shape_cast %82 : vector<8xf32> to vector<8x1xf32>
    %cst_37 = arith.constant 1.600000e+01 : f32
    %84 = vector.broadcast %cst_37 : f32 to vector<8x1xf32>
    %85 = arith.divf %83, %84 : vector<8x1xf32>
    %86 = vector.broadcast %78 : vector<8x1xf32> to vector<8x16xf32>
    %87 = arith.subf %71, %86 : vector<8x16xf32>
    %cst_38 = arith.constant 9.99999974E-6 : f32
    %88 = vector.broadcast %cst_38 : f32 to vector<8x1xf32>
    %89 = arith.addf %85, %88 : vector<8x1xf32>
    %90 = math.rsqrt %89 : vector<8x1xf32>
    %91 = vector.broadcast %90 : vector<8x1xf32> to vector<8x16xf32>
    %92 = arith.mulf %87, %91 : vector<8x16xf32>
    %93 = vector.broadcast %73 : vector<1x16xf32> to vector<8x16xf32>
    %94 = arith.mulf %92, %93 : vector<8x16xf32>
    %95 = vector.broadcast %74 : vector<1x16xf32> to vector<8x16xf32>
    %96 = arith.addf %94, %95 : vector<8x16xf32>
    %c0_39 = arith.constant 0 : index
    %c0_40 = arith.constant 0 : index
    %97 = vector.load %arg8[%c0_39, %c0_40] : memref<8x16xf32, #tpu.memory_space<vmem>>, vector<8x16xf32>
    %98 = arith.mulf %96, %97 : vector<8x16xf32>
    %cst_41 = arith.constant dense<0.000000e+00> : vector<8xf32>
    %99 = vector.multi_reduction <add>, %98, %cst_41 [1] : vector<8x16xf32> to vector<8xf32>
    %100 = vector.shape_cast %99 : vector<8xf32> to vector<8x1xf32>
    %cst_42 = arith.constant dense<0.000000e+00> : vector<1xf32>
    %101 = vector.multi_reduction <add>, %100, %cst_42 [0] : vector<8x1xf32> to vector<1xf32>
    %102 = vector.shape_cast %101 : vector<1xf32> to vector<1x1xf32>
    %c0_i32 = arith.constant 0 : i32
    %103 = arith.cmpi eq, %arg0, %c0_i32 : i32
    %104 = arith.extui %103 : i1 to i32
    %c0_i32_43 = arith.constant 0 : i32
    %105 = arith.cmpi ne, %104, %c0_i32_43 : i32
    scf.if %105 {
      %cst_59 = arith.constant 0.000000e+00 : f32
      %134 = vector.broadcast %cst_59 : f32 to vector<1x1xf32>
      %c0_60 = arith.constant 0 : index
      %c0_61 = arith.constant 0 : index
      %135 = vector.load %arg12[%c0_60, %c0_61] : memref<1x1xf32, #tpu.memory_space<vmem>>, vector<1x1xf32>
      tpu.vector_store %arg12[%c0_60, %c0_61], %134 {strides = array<i32>} : memref<1x1xf32, #tpu.memory_space<vmem>>, vector<1x1xf32>,
    } else {
    }
    %c0_44 = arith.constant 0 : index
    %c0_45 = arith.constant 0 : index
    %106 = vector.load %arg12[%c0_44, %c0_45] : memref<1x1xf32, #tpu.memory_space<vmem>>, vector<1x1xf32>
    %107 = arith.addf %106, %102 : vector<1x1xf32>
    %c0_46 = arith.constant 0 : index
    %c0_47 = arith.constant 0 : index
    %108 = vector.load %arg12[%c0_46, %c0_47] : memref<1x1xf32, #tpu.memory_space<vmem>>, vector<1x1xf32>
    tpu.vector_store %arg12[%c0_46, %c0_47], %107 {strides = array<i32>} : memref<1x1xf32, #tpu.memory_space<vmem>>, vector<1x1xf32>,
    %c0_48 = arith.constant 0 : index
    %c0_49 = arith.constant 0 : index
    %109 = vector.load %arg9[%c0_48, %c0_49] : memref<1x16xf32, #tpu.memory_space<vmem>>, vector<1x16xf32>
    %c0_50 = arith.constant 0 : index
    %c0_51 = arith.constant 0 : index
    %110 = vector.load %arg10[%c0_50, %c0_51] : memref<1x16xf32, #tpu.memory_space<vmem>>, vector<1x16xf32>
    %cst_52 = arith.constant dense<0.000000e+00> : vector<8xf32>
    %111 = vector.multi_reduction <add>, %72, %cst_52 [1] : vector<8x16xf32> to vector<8xf32>
    %112 = vector.shape_cast %111 : vector<8xf32> to vector<8x1xf32>
    %cst_53 = arith.constant 1.600000e+01 : f32
    %113 = vector.broadcast %cst_53 : f32 to vector<8x1xf32>
    %114 = arith.divf %112, %113 : vector<8x1xf32>
    %115 = vector.broadcast %114 : vector<8x1xf32> to vector<8x16xf32>
    %116 = arith.subf %72, %115 : vector<8x16xf32>
    %117 = arith.mulf %116, %116 : vector<8x16xf32>
    %cst_54 = arith.constant dense<0.000000e+00> : vector<8xf32>
    %118 = vector.multi_reduction <add>, %117, %cst_54 [1] : vector<8x16xf32> to vector<8xf32>
    %119 = vector.shape_cast %118 : vector<8xf32> to vector<8x1xf32>
    %cst_55 = arith.constant 1.600000e+01 : f32
    %120 = vector.broadcast %cst_55 : f32 to vector<8x1xf32>
    %121 = arith.divf %119, %120 : vector<8x1xf32>
    %122 = vector.broadcast %114 : vector<8x1xf32> to vector<8x16xf32>
    %123 = arith.subf %72, %122 : vector<8x16xf32>
    %cst_56 = arith.constant 9.99999974E-6 : f32
    %124 = vector.broadcast %cst_56 : f32 to vector<8x1xf32>
    %125 = arith.addf %121, %124 : vector<8x1xf32>
    %126 = math.rsqrt %125 : vector<8x1xf32>
    %127 = vector.broadcast %126 : vector<8x1xf32> to vector<8x16xf32>
    %128 = arith.mulf %123, %127 : vector<8x16xf32>
    %129 = vector.broadcast %109 : vector<1x16xf32> to vector<8x16xf32>
    %130 = arith.mulf %128, %129 : vector<8x16xf32>
    %131 = vector.broadcast %110 : vector<1x16xf32> to vector<8x16xf32>
    %132 = arith.addf %130, %131 : vector<8x16xf32>
    %c0_57 = arith.constant 0 : index
    %c0_58 = arith.constant 0 : index
    %133 = vector.load %arg11[%c0_57, %c0_58] : memref<8x16xf32, #tpu.memory_space<vmem>>, vector<8x16xf32>
    tpu.vector_store %arg11[%c0_57, %c0_58], %132 {strides = array<i32>} : memref<8x16xf32, #tpu.memory_space<vmem>>, vector<8x16xf32>,
    return
  }
  func.func @transform_0(%arg0: i32) -> (i32, i32) {
    %c0_i32 = arith.constant 0 : i32
    %c0_i32_0 = arith.constant 0 : i32
    return %arg0, %c0_i32 : i32, i32
  }
  func.func @transform_1(%arg0: i32) -> (i32, i32) {
    %c0_i32 = arith.constant 0 : i32
    %c0_i32_0 = arith.constant 0 : i32
    %c0_i32_1 = arith.constant 0 : i32
    return %c0_i32, %c0_i32_0 : i32, i32
  }
  func.func @transform_2(%arg0: i32) -> (i32, i32) {
    %c0_i32 = arith.constant 0 : i32
    %c0_i32_0 = arith.constant 0 : i32
    %c0_i32_1 = arith.constant 0 : i32
    return %c0_i32, %c0_i32_0 : i32, i32
  }
  func.func @transform_3(%arg0: i32) -> (i32, i32) {
    %c0_i32 = arith.constant 0 : i32
    %c0_i32_0 = arith.constant 0 : i32
    %c0_i32_1 = arith.constant 0 : i32
    return %c0_i32, %c0_i32_0 : i32, i32
  }
  func.func @transform_4(%arg0: i32) -> (i32, i32) {
    %c0_i32 = arith.constant 0 : i32
    %c0_i32_0 = arith.constant 0 : i32
    %c0_i32_1 = arith.constant 0 : i32
    return %c0_i32, %c0_i32_0 : i32, i32
  }
  func.func @transform_5(%arg0: i32) -> (i32, i32) {
    %c0_i32 = arith.constant 0 : i32
    %c0_i32_0 = arith.constant 0 : i32
    %c0_i32_1 = arith.constant 0 : i32
    return %c0_i32, %c0_i32_0 : i32, i32
  }
  func.func @transform_6(%arg0: i32) -> (i32, i32) {
    %c0_i32 = arith.constant 0 : i32
    %c0_i32_0 = arith.constant 0 : i32
    %c0_i32_1 = arith.constant 0 : i32
    return %c0_i32, %c0_i32_0 : i32, i32
  }
  func.func @transform_7(%arg0: i32) -> (i32, i32) {
    %c0_i32 = arith.constant 0 : i32
    %c0_i32_0 = arith.constant 0 : i32
    %c0_i32_1 = arith.constant 0 : i32
    return %c0_i32, %c0_i32_0 : i32, i32
  }
  func.func @transform_8(%arg0: i32) -> (i32, i32) {
    %c0_i32 = arith.constant 0 : i32
    %c0_i32_0 = arith.constant 0 : i32
    %c0_i32_1 = arith.constant 0 : i32
    return %c0_i32, %c0_i32_0 : i32, i32
  }
  func.func @transform_9(%arg0: i32) -> (i32, i32) {
    %c0_i32 = arith.constant 0 : i32
    %c0_i32_0 = arith.constant 0 : i32
    %c0_i32_1 = arith.constant 0 : i32
    return %c0_i32, %c0_i32_0 : i32, i32
  }
  func.func @transform_10(%arg0: i32) -> (i32, i32) {
    %c0_i32 = arith.constant 0 : i32
    %c0_i32_0 = arith.constant 0 : i32
    return %arg0, %c0_i32 : i32, i32
  }
  func.func @transform_11(%arg0: i32) -> (i32, i32) {
    %c0_i32 = arith.constant 0 : i32
    %c0_i32_0 = arith.constant 0 : i32
    %c0_i32_1 = arith.constant 0 : i32
    return %c0_i32, %c0_i32_0 : i32, i32
  }
}

</mosaic_0001>

<bundles_post_ra>
// kernel: tpu_custom_call.1
= control target key start
LH: loop header
LB: loop body
LE: loop exit
PB: predicated region body
PF: predicated region fallthrough
CT: control target
= control target key end

     0   :  { %s1406_s0 = inlined_call_operand.hbm [shape: f32[16,32], index: 0, kind: input, shape index: {}]   ;;  %s1407_s1 = inlined_call_operand.vmem [shape: f32[1,32], index: 1, kind: input, shape index: {}]   ;;  %s1408_s2 = inlined_call_operand.vmem [shape: f32[1,32], index: 2, kind: input, shape index: {}]   ;;  %s1409_s3 = inlined_call_operand.hbm [shape: f32[32,32], index: 3, kind: input, shape index: {}]   ;;  %s1410_s4 = inlined_call_operand.vmem [shape: f32[1,32], index: 4, kind: input, shape index: {}]   ;;  %s1411_s5 = inlined_call_operand.vmem [shape: f32[1,16], index: 5, kind: input, shape index: {}]   ;;  %s1412_s6 = inlined_call_operand.hbm [shape: f32[1,16], index: 6, kind: input, shape index: {}]   ;;  %s1413_s7 = inlined_call_operand.vmem [shape: f32[8,16], index: 7, kind: input, shape index: {}]   ;;  %s1414_s8 = inlined_call_operand.vmem [shape: f32[1,16], index: 8, kind: input, shape index: {}]   ;;  %s1415_s9 = inlined_call_operand.vmem [shape: f32[1,16], index: 9, kind: input, shape index: {}]   ;;  %s1416_s10 = inlined_call_operand.hbm [shape: f32[16,16], index: 10, kind: output, shape index: {0}]   ;;  %s1417_s11 = inlined_call_operand.hbm [shape: f32[1,1], index: 11, kind: output, shape index: {1}]  }
   0x1   :  { %1426 = sst [smem:[#allocation19_spill]] %s1409_s3 }
   0x2   :  { %1427 = sst [smem:[#allocation20_spill]] %s1412_s6 }
   0x3   :  { %17 = vsyncpa [#allocation3], 0 }
   0x4   :  { %19 = vsyncpa [#allocation3 + $0x1], 0 }
   0x5   :  { %20 = vsyncpa [#allocation6], 0 }
   0x6   :  { %21 = vsyncpa [#allocation4], 0 }
   0x7   :  { %23 = vsyncpa [#allocation4 + $0x1], 0 }
   0x8   :  { %24 = vsyncpa [#allocation10], 0  ;;  %s1180_s17 = smov 0   ;;  %s1182_s18 = smov 0  }
   0x9   :  { %s1184_s19 = smov 0   ;;  %s1186_s20 = smov 0  }
   0xa LB: > { %1428 = sst [smem:[#allocation15_spill]] %s1101_s19  ;;  %s1201_s21 = sadd.s32 4294967295, %s1105_s20   ;;  %s1105_s20 = sphi %s1186_s20, %s1454_s20   ;;  %s1101_s19 = sphi %s1184_s19, %s1456_s19   ;;  %s1097_s18 = sphi %s1182_s18, %s1458_s18   ;;  %s1093_s17 = sphi %s1180_s17, %s1457_s17  }
   0xb   : > { %1429 = sst [smem:[#allocation16_spill]] %s1105_s20  ;;  %s794_s22 = sadd.s32 4294967294, %s1105_s20  }
   0xc   : > { %p50_p0 = scmp.ne.s32.totalorder %s1097_s18, %s1093_s17  ;;  %p1418_p1 = scmp.eq.s32.totalorder %s1201_s21, 0 }
   0xd   : > { %p269_p3 = scmp.eq.s32.totalorder %s794_s22, 1  ;;  %p795_p5 = scmp.ge.s32.totalorder %s1105_s20, 1 }
   0xe   : > { %p1210_p4 = por %p1418_p1, %p50_p0  ;;  %p297_p7 = scmp.lt.s32.totalorder %s1105_s20, 3 }
   0xf   : > { %p1215_p6 = por %p269_p3, %p50_p0  ;;  %s1107_s26 = smov [#allocation5]  }
  0x10   : > { %s1430_s23 = scalar_select %p1210_p4, 1, 0 }
  0x11   : > { %s1431_s24 = scalar_select %p1215_p6, 1, 0 }
  0x12   : > { %p1221_p9 = pnand %p795_p5, %p297_p7  ;;  %s315_s27 = sshll.u32 %s1107_s26, 4  ;;  %s316_s27 = int_to_ptr.vmem [resolvable:$true] %s315_s27 }
  0x13   : > { %s1108_s29 = smov [#allocation7]   ;;  %s940_s12 = scalar_lea.vmem %s316_s27, 512 }
  0x14   : > { %s1432_s25 = scalar_select %p1221_p9, 1, 0 }
  0x15   : > { %p853_p10 = pneg %p1221_p9  ;;  %s335_s30 = sshll.u32 %s1108_s29, 4  ;;  %s336_s30 = int_to_ptr.vmem [resolvable:$true] %s335_s30 }
  0x16   : > { %p941_p0 = scmp.ne.s32.totalorder %s316_s27, %s940_s12  ;;  %p948_p7 = scmp.lt.s32.totalorder %s316_s27, %s316_s27 }
  0x17   : > { %p1230_p12 = pnand %p853_p10, %p1418_p1  ;;  %p949_p11 = scmp.lt.s32.totalorder %s940_s12, %s940_s12 }
  0x19   : > { %p931_p13 = pneg %p1230_p12  ;;  %p950_p8 = por %p949_p11, %p948_p7 }
  0x1b   : > { %p943_p3 = pnand %p941_p0, %p931_p13 }
  0x1d   : > { %p944_p5 = pneg %p943_p3 }
  0x1f   : > { %p951_p10 = pnand %p950_p8, %p944_p5 }
  0x21   : > { %954 = shalt.err (!%p951_p10)
}
  0x22   : > { %s1109_s13 = smov 128   ;;  %s1110_s14 = smov 8  }
  0x23   : > { %s1434_s3 = sld [smem:[#allocation19_spill]]  ;;  %s966_s22 = scalar_lea.vmem %s336_s30, 16 }
  0x24   : > { %p967_p1 = scmp.ne.s32.totalorder %s336_s30, %s966_s22  ;;  %s973_s26 = scalar_lea.vmem %s336_s30, 32 }
  0x25   : > { %p974_p2 = scmp.lt.s32.totalorder %s336_s30, %s336_s30  ;;  %p975_p11 = scmp.lt.s32.totalorder %s973_s26, %s966_s22 }
  0x26   : > { %p969_p0 = pnand %p967_p1, %p931_p13 }
  0x27   : > { %p976_p8 = por %p975_p11, %p974_p2 }
  0x28   : > { %p970_p3 = pneg %p969_p0 }
  0x29   : > { %856 = dma.hbm_to_vmem [thread:$0]  (!%p1230_p12), %s1434_s3, 512, %s316_s27, [#allocation6], %s1109_s13, %s1109_s13, %s1110_s14  }
  0x2a   : > { %p977_p5 = pnand %p976_p8, %p970_p3 }
  0x2c   : > { %980 = shalt.err (!%p977_p5)
}
  0x2d   : > { %s1435_s6 = sld [smem:[#allocation20_spill]]  ;;  %s1253_s27 = sadd.s32 1, %s1105_s20  }
  0x2e   : > { %1436 = sst [smem:[#allocation17_spill]] %s1253_s27  ;;  %s37_s13 = sadd.s32 1, %s1101_s19 }
  0x2f   : > { %s34_s28 = ssub.s32 %s1105_s20, %s1253_s27  ;;  %p44_p1 = scmp.ne.s32.totalorder %s1101_s19, %s1097_s18 }
  0x30   : > { %p35_p2 = scmp.eq.s32.totalorder %s34_s28, 0  ;;  %p45_p13 = scmp.eq.s32.totalorder %s1105_s20, 0 }
  0x31   : > { %p1437_p7 = scmp.eq.s32.totalorder %s1201_s21, 1  ;;  %p870_p0 = scmp.lt.s32.totalorder %s1105_s20, 2 }
  0x32   : > { %s1269_s15 = scalar_select %p35_p2, %s1101_s19, %s37_s13  }
  0x33   : > { %859 = dma.hbm_to_vmem [thread:$0]  (!%p1230_p12), %s1435_s6, 16, %s336_s30, [#allocation6]  }
  0x34   : > { %p1263_p10 = por %p1437_p7, %p44_p1  ;;  %1439 = sst [smem:[#allocation18_spill]] %s1269_s15 }
  0x35   : > { %p46_p3 = por %p45_p13, %p44_p1  ;;  %s355_s16 = sand.u32 1, %s1101_s19  }
  0x36   : > { %s1438_s14 = scalar_select %p1263_p10, 1, 0 }
  0x37   : > { %s799_s22 = sshll.u32 %s355_s16, 3  ;;  %s800_s30 = sshll.u32 %s1105_s20, 7 }
  0x38   : > { %s1276_s12 = scalar_lea.hbm %s1406_s0, %s800_s30  ;;  %s359_s28 = scalar_lea.vmem [#allocation2], %s799_s22 }
  0x39   : > { %s366_s3 = sshll.u32 %s359_s28, 4  ;;  %p1278_p12 = pnand %p870_p0, %p46_p3  ;;  %s367_s3 = int_to_ptr.vmem [resolvable:$true] %s366_s3 }
  0x3a   : > { %s356_s13 = scalar_lea.sflag [#allocation3], %s355_s16  ;;  %s981_s15 = scalar_lea.hbm %s1276_s12, 128 }
  0x3b   : > { %p982_p11 = scmp.ne.s32.totalorder %s1276_s12, %s981_s15  ;;  %p983_p8 = pneg %p1278_p12 }
  0x3c   : > { %s986_s29 = scalar_lea.hbm %s1406_s0, 256  ;;  %p987_p2 = scmp.lt.s32.totalorder %s1276_s12, %s1406_s0 }
  0x3d   : > { %p984_p5 = pnand %p983_p8, %p982_p11  ;;  %p988_p13 = scmp.lt.s32.totalorder %s986_s29, %s981_s15 }
  0x3f   : > { %p985_p1 = pneg %p984_p5  ;;  %p989_p7 = por %p988_p13, %p987_p2 }
  0x41   : > { %p990_p0 = pnand %p989_p7, %p985_p1 }
  0x43   : > { %993 = shalt.err (!%p990_p0)
}
  0x44   : > { %s994_s28 = scalar_lea.vmem %s367_s3, 128  ;;  %s1111_s16 = smov [#allocation2]  }
  0x45   : > { %p995_p3 = scmp.ne.s32.totalorder %s367_s3, %s994_s28  ;;  %s999_s27 = sshll.u32 %s1111_s16, 4  ;;  %s1000_s27 = int_to_ptr.vmem [resolvable:$false] %s999_s27 }
  0x46   : > { %s1001_s20 = scalar_lea.vmem %s1000_s27, 256  ;;  %p1002_p11 = scmp.lt.s32.totalorder %s367_s3, %s1000_s27 }
  0x47   : > { %p997_p6 = pnand %p995_p3, %p983_p8  ;;  %p1003_p5 = scmp.lt.s32.totalorder %s1001_s20, %s994_s28 }
  0x49   : > { %p998_p10 = pneg %p997_p6  ;;  %p1004_p4 = por %p1003_p5, %p1002_p11 }
  0x4b   : > { %p1005_p9 = pnand %p1004_p4, %p998_p10 }
  0x4d   : > { %1008 = shalt.err (!%p1005_p9)
}
  0x4e   : > { %863 = dma.hbm_to_vmem [thread:$0]  (!%p1278_p12), %s1276_s12, 128, %s367_s3, %s356_s13  }
  0x4f   : > { %p1441_p1 = scmp.ne.s32.totalorder %s1432_s25, 0 }
  0x50   : > { %s1299_s19 = sand.u32 (!%p1441_p1), 1, %s1097_s18   ;;  %p1442_p4 = scmp.ne.s32.totalorder (!%p1441_p1), %s1430_s23, 0 }
  0x51   : > { %375 = sbr.rel (%p1441_p1) target bundleno = 1778 (0x6f2), region = 60  ;;  %s802_s15 = sshll.u32 (!%p1441_p1), %s1299_s19, 3 }
  0x52   : > { %s378_s27 = scalar_lea.sflag (!%p1441_p1), [#allocation3], %s1299_s19  ;;  %s381_s20 = scalar_lea.vmem (!%p1441_p1), [#allocation2], %s802_s15 }
  0x56   : > { %1076 = dma.done.wait (%p1442_p4), %s378_s27, 128  }
  0x57   : > { %1078 = vsyncadd (%p1442_p4), %s378_s27, 4294967168  ;;  %p1443_p6 = scmp.eq.s32.totalorder %s1201_s21, 0 }
  0x59   : > { %1080 = dma.done.wait (%p1443_p6), [#allocation6], 528   ;;  %p1444_p9 = pmov %p1443_p6 }
  0x5a   : > { %vm431_vm0 = vcmask 261120   ;;  %v428_v0 = vld [vmem:[%s381_s20] sm:$0xff]  ;;  %v1112_v8 = vmov 0.0   ;;  %vm1113_vm1 = vmmov 0   ;;  %v461_v10 = vld [vmem:[#allocation5 + $0x8] sm:$0xff]  ;;  %v460_v11 = vld [vmem:[#allocation5] sm:$0xff] }
  0x5b   : > { %1082 = vsyncadd (%p1444_p9), [#allocation6], 4294966768  ;;  %v432_v1 = vsel %vm431_vm0, %v428_v0, 0.0  ;;  %v463_v7 = vld [vmem:[#allocation5 + $0x18] sm:$0xff]  ;;  %826 = vmatprep.subr.mxu0 %v1112_v8  ;;  %v462_v9 = vld [vmem:[#allocation5 + $0x10] sm:$0xff]  ;;  %834 = vmatprep.mubr.msk.f32.mxu0 %vm1113_vm1, %v1112_v8  ;;  %v1114_v45 = vmov -1.0  }
  0x5c   : > { %433 = vadd.xlane.f32.xlu0 %v432_v1  ;;  %827 = vmatpush3.msra.mxu0 %v463_v7  ;;  %v806_v16 = vld [vmem:[%s1407_s1] ss:$0 sm:$0xff]  ;;  %vm573_vm3 = vcmask 130048   ;;  %v811_v63 = vld [vmem:[#allocation7] ss:$0 sm:$0xff]  ;;  %s1336_s28 = scalar_lea.vmem [#allocation8], %s802_s15 }
  0x5d   : > { %828 = vmatprep.subr.mxu0 %v1112_v8  ;;  %v807_v18 = vld [vmem:[%s1408_s2] ss:$0 sm:$0xff]  ;;  %p1445_p10 = scmp.ne.s32.totalorder %s1201_s21, 0 }
  0x5e   : > { %829 = vmatpush3.msra.mxu0 %v462_v9  ;;  %v808_v21 = vld [vmem:[%s1410_s4] ss:$0 sm:$0xff] }
  0x5f   : > { %830 = vmatprep.subr.mxu0 %v1112_v8  ;;  %v810_v61 = vld [vmem:[%s1411_s5] ss:$0 sm:$0xff] }
  0x60   : > { %831 = vmatpush3.msra.mxu0 %v461_v10  ;;  %v602_v1 = vld [vmem:[%s1413_s7] sm:$0xff] }
  0x61   : > { %832 = vmatprep.subr.mxu0 %v1112_v8 }
  0x62   : > { %833 = vmatpush3.msra.mxu0 %v460_v11 }
  0xe5   : > { %v434_v2 = vpop.xlane.xlu0 %433 }
  0xe6   : > { %v436_v3 = vmul.f32 0.03125, %v434_v2 }
  0xe8   : > { %v437_v4 = vsub.f32 %v428_v0, %v436_v3 }
  0xea   : > { %v438_v5 = vmul.f32 %v437_v4, %v437_v4 }
  0xec   : > { %v439_v6 = vsel %vm431_vm0, %v438_v5, 0.0 }
  0xed   : > { %440 = vadd.xlane.f32.xlu0 %v439_v6 }
 0x176   : > { %v441_v12 = vpop.xlane.xlu0 %440 }
 0x177   : > { %v442_v13 = vmul.f32 0.03125, %v441_v12 }
 0x179   : > { %v443_v14 = vadd.f32 1e-12, %v442_v13 }
 0x17b   : > { %919 = vrsqrt.f32 %v443_v14 }
 0x188   : > { %v920_v15 = vpop.eup %919 }
 0x189   : > { %v445_v17 = vmul.f32 %v920_v15, %v437_v4 }
 0x18b   : > { %v452_v19 = vmul.f32 %v806_v16, %v445_v17 }
 0x18d   : > { %v459_v20 = vadd.f32 %v807_v18, %v452_v19 }
 0x18f   : > { %835 = vmatmul.mubr.msk.f32.vlgmr.msra.gmra.mxu0 %vm431_vm0, %v459_v20 }
 0x24f   : > { %v540_v22 = vpop.f32.mrf.mxu0 }
 0x250   : > { %v541_v23 = vadd.f32 %v808_v21, %v540_v22 }
 0x251   : > { %v836_v24 = vpop.f32.mrf.mxu0 }
 0x252   : > { %v545_v25 = vmul.f32 0.70710677, %v541_v23  ;;  %v544_v48 = vmul.f32 0.5, %v541_v23 }
 0x254   : > { %v548_v26 = vand.u32 2147483647, %v545_v25  ;;  %vm546_vm2 = vcmp.ge.f32.partialorder %v545_v25, 0.0 }
 0x255   : > { %v547_v46 = vsel %vm546_vm2, 1.0, %v1114_v45 }
 0x256   : > { %v549_v27 = vmul.f32 0.3275911, %v548_v26  ;;  %v562_v29 = vsub.f32 0.0, %v548_v26 }
 0x258   : > { %v550_v28 = vadd.f32 1.0, %v549_v27  ;;  %v563_v30 = vmul.f32 %v562_v29, %v548_v26 }
 0x25a   : > { %921 = vrcp.f32 %v550_v28  ;;  %v564_v32 = vmul.f32 1.442695, %v563_v30 }
 0x25c   : > { %923 = vpow2.f32 %v564_v32 }
 0x267   : > { %v922_v31 = vpop.eup %921 }
 0x268   : > { %v553_v33 = vmul.f32 1.0614054, %v922_v31 }
 0x269   : > { %v924_v42 = vpop.eup %923 }
 0x26a   : > { %v554_v34 = vadd.f32 -1.4531521, %v553_v33 }
 0x26c   : > { %v555_v35 = vmul.f32 %v922_v31, %v554_v34 }
 0x26e   : > { %v556_v36 = vadd.f32 1.4214138, %v555_v35 }
 0x270   : > { %v557_v37 = vmul.f32 %v922_v31, %v556_v36 }
 0x272   : > { %v558_v38 = vadd.f32 -0.28449672, %v557_v37 }
 0x274   : > { %v559_v39 = vmul.f32 %v922_v31, %v558_v38 }
 0x276   : > { %v560_v40 = vadd.f32 0.2548296, %v559_v39 }
 0x278   : > { %v561_v41 = vmul.f32 %v922_v31, %v560_v40 }
 0x27a   : > { %v566_v43 = vmul.f32 %v924_v42, %v561_v41 }
 0x27c   : > { %v567_v44 = vsub.f32 1.0, %v566_v43 }
 0x27e   : > { %v568_v47 = vmul.f32 %v567_v44, %v547_v46 }
 0x280   : > { %v569_v49 = vadd.f32 1.0, %v568_v47 }
 0x282   : > { %v570_v50 = vmul.f32 %v569_v49, %v544_v48 }
 0x284   : > { %v574_v51 = vsel %vm573_vm3, %v570_v50, 0.0 }
 0x285   : > { %575 = vadd.xlane.f32.xlu1 %v574_v51 }
 0x30e   : > { %v576_v52 = vpop.xlane.xlu1 %575 }
 0x30f   : > { %v578_v53 = vmul.f32 0.0625, %v576_v52 }
 0x311   : > { %v579_v54 = vsub.f32 %v570_v50, %v578_v53 }
 0x313   : > { %v580_v55 = vmul.f32 %v579_v54, %v579_v54 }
 0x315   : > { %v581_v56 = vsel %vm573_vm3, %v580_v55, 0.0 }
 0x316   : > { %582 = vadd.xlane.f32.xlu1 %v581_v56 }
 0x39f   : > { %v583_v57 = vpop.xlane.xlu1 %582 }
 0x3a0   : > { %v584_v58 = vmul.f32 0.0625, %v583_v57 }
 0x3a2   : > { %v585_v59 = vadd.f32 1e-05, %v584_v58 }
 0x3a4   : > { %925 = vrsqrt.f32 %v585_v59 }
 0x3b1   : > { %v926_v60 = vpop.eup %925 }
 0x3b2   : > { %v587_v62 = vmul.f32 %v926_v60, %v579_v54 }
 0x3b4   : > { %v594_v0 = vmul.f32 %v810_v61, %v587_v62 }
 0x3b6   : > { %v601_v2 = vadd.f32 %v811_v63, %v594_v0 }
 0x3b8   : > { %v603_v3 = vmul.f32 %v602_v1, %v601_v2 }
 0x3ba   : > { %v604_v4 = vsel %vm573_vm3, %v603_v3, 0.0 }
 0x3bb   : > { %605 = vadd.xlane.f32.xlu0 %v604_v4 }
 0x444   : > { %v606_v5 = vpop.xlane.xlu0 %605 }
 0x445   : > { %v607_v6 = vrot.slane %v606_v5, 4 }
 0x447   : > { %v608_v7 = vadd.f32 %v607_v6, %v606_v5 }
 0x449   : > { %v609_v8 = vrot.slane %v608_v7, 2 }
 0x44b   : > { %v610_v9 = vadd.f32 %v609_v8, %v608_v7  ;;  %616 = sbr.rel (%p1445_p10) target bundleno = 1106 (0x452), region = 76 }
 0x44d   : > { %v611_v10 = vrot.slane %v610_v9, 1 }
 0x44f   : > { %v612_v11 = vadd.f32 %v611_v10, %v610_v9 }
 0x450   : > { %vm617_vm4 = vcmask 0   ;;  %v1115_v12 = vmov 0.0  }
 0x451   : > { %618 = vst.msk [vmem:[#allocation9] sm:$0x1] %vm617_vm4, %v1115_v12 }
 0x452 PF: > { %s1116_s16 = smov 112   ;;  %v813_v15 = vld [vmem:[%s1414_s8] ss:$0 sm:$0xff]  ;;  %s1117_s15 = smov 16   ;;  %vm621_vm5 = vcmask 0  }
 0x453   : > { %626 = vrot.lane.b32.xlu0 %v570_v50, %s1116_s16  ;;  %v814_v22 = vld [vmem:[%s1415_s9] ss:$0 sm:$0xff]  ;;  %s1118_s23 = smov [#allocation9]   ;;  %p1446_p8 = scmp.eq.s32.totalorder %s1201_s21, 1 }
 0x454   : > { %s694_s25 = sshll.u32 %s1118_s23, 4  ;;  %s695_s25 = int_to_ptr.vmem [resolvable:$true] %s694_s25 }
 0x455   : > { %s1009_s12 = scalar_lea.vmem %s695_s25, 16  ;;  %s1015_s13 = scalar_lea.vmem %s695_s25, 32 }
 0x456   : > { %p1010_p12 = scmp.ne.s32.totalorder %s695_s25, %s1009_s12  ;;  %p1016_p7 = scmp.lt.s32.totalorder %s695_s25, %s695_s25 }
 0x457   : > { %p1017_p0 = scmp.lt.s32.totalorder %s1015_s13, %s1009_s12 }
 0x458   : > { %v619_v26 = vld [vmem:[#allocation9] sm:$0x1]  ;;  %p1011_p2 = pnand %p1010_p12, %p1446_p8 }
 0x459   : > { %v620_v27 = vadd.f32 %v619_v26, %v612_v11  ;;  %p1018_p3 = por %p1017_p0, %p1016_p7 }
 0x45a   : > { %p1012_p13 = pneg %p1011_p2 }
 0x45b   : > { %622 = vst.msk [vmem:[#allocation9] sm:$0x1] %vm621_vm5, %v620_v27 }
 0x45c   : > { %p1019_p11 = pnand %p1018_p3, %p1012_p13 }
 0x4c5   : > { %v627_v13 = vpop.permute.xlu0 %626 }
 0x4c6   : > { %v629_v14 = vsel %vm573_vm3, %v627_v13, 0.0 }
 0x4c7   : > { %630 = vadd.xlane.f32.xlu0 %v629_v14 }
 0x4dd   : > { %651 = vrot.lane.b32.xlu0 %v813_v15, %s1117_s15 }
 0x550   : > { %v631_v16 = vpop.xlane.xlu0 %630 }
 0x551   : > { %v632_v17 = vmul.f32 0.0625, %v631_v16 }
 0x553   : > { %v633_v18 = vsub.f32 %v570_v50, %v632_v17 }
 0x555   : > { %v634_v19 = vmul.f32 %v633_v18, %v633_v18 }
 0x557   : > { %636 = vrot.lane.b32.xlu1 %v634_v19, %s1116_s16 }
 0x5c9   : > { %v637_v20 = vpop.permute.xlu1 %636 }
 0x5ca   : > { %v639_v21 = vsel %vm573_vm3, %v637_v20, 0.0 }
 0x5cb   : > { %640 = vadd.xlane.f32.xlu1 %v639_v21 }
 0x5dc   : > { %660 = vrot.lane.b32.xlu1 %v814_v22, %s1117_s15 }
 0x654   : > { %v641_v23 = vpop.xlane.xlu1 %640 }
 0x655   : > { %v642_v24 = vmul.f32 0.0625, %v641_v23 }
 0x657   : > { %v643_v25 = vadd.f32 1e-05, %v642_v24 }
 0x659   : > { %927 = vrsqrt.f32 %v643_v25 }
 0x65a   : > { %1022 = shalt.err (!%p1019_p11)
}
 0x65b   : > { %p1447_p5 = pmov %p1446_p8  ;;  %v652_v29 = vpop.permute.xlu0 %651  ;;  %v661_v31 = vpop.permute.xlu1 %660  ;;  %s816_s29 = sshll.u32 %s1201_s21, 7 }
 0x65c   : > { %s683_s22 = sshll.u32 %s1336_s28, 4  ;;  %s1363_s15 = scalar_lea.hbm %s1416_s10, %s816_s29  ;;  %s684_s22 = int_to_ptr.vmem [resolvable:$true] %s683_s22 }
 0x65d   : > { %849 = dma.vmem_to_hbm [thread:$0]  (%p1447_p5), %s695_s25, 16, %s1417_s11, [#allocation10]  }
 0x65e   : > { %s670_s3 = scalar_lea.sflag [#allocation4], %s1299_s19  ;;  %s1033_s6 = scalar_lea.vmem %s684_s22, 128 }
 0x65f   : > { %p1034_p1 = scmp.ne.s32.totalorder %s684_s22, %s1033_s6  ;;  %p1448_p4 = scmp.ne.s32.totalorder %s1438_s14, 0 }
 0x660   : > { %s1119_s23 = smov [#allocation8]  }
 0x661   : > { %p1035_p6 = pnand %p1034_p1, %p1448_p4  ;;  %s1037_s25 = sshll.u32 %s1119_s23, 4  ;;  %s1038_s25 = int_to_ptr.vmem [resolvable:$false] %s1037_s25 }
 0x662   : > { %p1040_p10 = scmp.lt.s32.totalorder %s684_s22, %s1038_s25 }
 0x663   : > { %p1036_p9 = pneg %p1035_p6 }
 0x666   : > { %v928_v28 = vpop.eup %927 }
 0x667   : > { %v645_v30 = vmul.f32 %v928_v28, %v633_v18 }
 0x669   : > { %v654_v32 = vmul.f32 %v652_v29, %v645_v30 }
 0x66b   : > { %v663_v33 = vadd.f32 %v661_v31, %v654_v32 }
 0x66d   : > { %665 = vrot.lane.b32.xlu0 %v663_v33, %s1116_s16  ;;  %s1039_s16 = scalar_lea.vmem %s1038_s25, 256 }
 0x66e   : > { %p1041_p12 = scmp.lt.s32.totalorder %s1039_s16, %s1033_s6 }
 0x670   : > { %p1042_p8 = por %p1041_p12, %p1040_p10 }
 0x672   : > { %p1043_p2 = pnand %p1042_p8, %p1036_p9 }
 0x6df   : > { %v666_v34 = vpop.permute.xlu0 %665 }
 0x6e0   : > { %668 = vst.msk [vmem:[%s1336_s28] sm:$0xff] %vm573_vm3, %v666_v34 }
 0x6e1   : > { %1046 = shalt.err (!%p1043_p2)
}
 0x6e2   : > { %s1047_s28 = scalar_lea.hbm %s1363_s15, 128  ;;  %s1051_s13 = scalar_lea.hbm %s1416_s10, 256 }
 0x6e3   : > { %p1048_p13 = scmp.ne.s32.totalorder %s1363_s15, %s1047_s28  ;;  %p1052_p3 = scmp.lt.s32.totalorder %s1363_s15, %s1416_s10 }
 0x6e4   : > { %p1053_p11 = scmp.lt.s32.totalorder %s1051_s13, %s1047_s28 }
 0x6e5   : > { %p1049_p7 = pnand %p1048_p13, %p1448_p4 }
 0x6e6   : > { %p1054_p5 = por %p1053_p11, %p1052_p3 }
 0x6e7   : > { %p1050_p0 = pneg %p1049_p7 }
 0x6e9   : > { %p1055_p1 = pnand %p1054_p5, %p1050_p0 }
 0x6eb   : > { %1058 = shalt.err (!%p1055_p1)
}
 0x6ec   : > { %847 = dma.vmem_to_hbm [thread:$0]  (%p1448_p4), %s684_s22, 128, %s1363_s15, %s670_s3  }
 0x6ed   : > { %p1449_p6 = scmp.eq.s32.totalorder %s1201_s21, 1 }
 0x6ef   : > { %1084 = dma.done.wait (%p1449_p6), [#allocation10], 16   ;;  %p1450_p9 = pmov %p1449_p6 }
 0x6f1   : > { %1086 = vsyncadd (%p1450_p9), [#allocation10], 4294967280 }
 0x6f2 PF: > { %s1451_s29 = sld [smem:[#allocation16_spill]]  ;;  %s710_s27 = sand.u32 1, %s1093_s17  }
 0x6f3   : > { %p1452_p10 = scmp.ne.s32.totalorder %s1431_s24, 0  ;;  %s711_s20 = scalar_lea.sflag [#allocation4], %s710_s27 }
 0x6f8   : > { %p1453_p12 = scmp.ge.s32.totalorder %s1451_s29, 2 }
 0x6fa   : > { %p865_p8 = pnand %p1453_p12, %p1452_p10 }
 0x6fc   : > { %p866_p2 = pneg %p865_p8 }
 0x6fe   : > { %1088 = dma.done.wait (%p866_p2), %s711_s20, 128  }
 0x6ff   : > { %1090 = vsyncadd (%p866_p2), %s711_s20, 4294967168  ;;  %s1454_s20 = sld [smem:[#allocation17_spill]]  ;;  %s1457_s17 = smov %s1097_s18 }
 0x700   : > { %s1455_s14 = sld [smem:[#allocation15_spill]] }
 0x701   : > { %s1456_s19 = sld [smem:[#allocation18_spill]] }
 0x705   : > { %p27_p4 = scmp.ge.s32.totalorder %s1454_s20, 4  }
 0x706   : > { %s1458_s18 = smov %s1455_s14 }
 0x707   :  { %29 = sbr.rel (!%p27_p4) target bundleno = 10 (0xa), region = 125 }
 0x70c   :  { %716 = vsyncpa [#allocation3], 1 }
 0x70d   :  { %718 = vsyncpa [#allocation3 + $0x1], 1 }
 0x70e   :  { %719 = vsyncpa [#allocation6], 1 }
 0x70f   :  { %720 = vsyncpa [#allocation4], 1 }
 0x710   :  { %722 = vsyncpa [#allocation4 + $0x1], 1 }
 0x711   :  { %723 = vsyncpa [#allocation10], 1 }

</bundles_post_ra>
